<compile_context>
chip_gen: v7x
topology: tpu7x:2x2x1
jax: 0.10.0
libtpu: 0.0.40
codegen_flags: <defaults>
</compile_context>

<pallas_src>
import math
import functools

import jax
import jax.numpy as jnp
from jax import lax
from jax.experimental import pallas as pl
from jax.experimental.pallas import tpu as pltpu

_NEG_INF = -1e30  # finite "minus infinity": no inf - inf -> NaN hazards


def _round_up(x, m):
    return ((x + m - 1) // m) * m


# -----------------------------------------------------------------------------
# Stage 1: fused QKV projection (runs once per token).
# -----------------------------------------------------------------------------
def _qkv_proj_kernel(x_ref, w_ref, b_ref, o_ref):
    y = jnp.dot(x_ref[0], w_ref[...], preferred_element_type=jnp.float32)
    o_ref[0] = (y + b_ref[...]).astype(o_ref.dtype)


# -----------------------------------------------------------------------------
# Stage 2: flash attention + fused output projection.
# Grid = (B, n_pairs): the pair axis enumerates only lower-triangular
# (query-tile, kv-tile) pairs via scalar-prefetch index tables.
# -----------------------------------------------------------------------------
def _flash_attn_kernel(qi_tbl, ki_tbl,                        # scalar prefetch (SMEM)
                       q_ref, k_ref, v_ref, wp_ref, bp_ref,   # inputs (VMEM)
                       o_ref,                                  # output (VMEM)
                       m_scr, l_scr, acc_scr, y_scr,           # VMEM scratch
                       *, n_head, tile_s):
    p = pl.program_id(1)
    qi = qi_tbl[p]
    ki = ki_tbl[p]

    # ---- first kv tile of this query tile: reset online-softmax state -------
    @pl.when(ki == 0)
    def _():
        m_scr[...] = jnp.full_like(m_scr, _NEG_INF)
        l_scr[...] = jnp.zeros_like(l_scr)
        acc_scr[...] = jnp.zeros_like(acc_scr)

    def process_tile(apply_mask):
        if apply_mask:
            # Only the diagonal tile needs a mask; tq == tk and ki == qi, so
            # tile-relative indices give exactly the causal pattern.
            rows = lax.broadcasted_iota(jnp.int32, (tile_s, tile_s), 0)
            cols = lax.broadcasted_iota(jnp.int32, (tile_s, tile_s), 1)
            mask_bias = jnp.where(cols <= rows, 0.0, _NEG_INF).astype(jnp.float32)

        def head_body(h, carry):
            qh = q_ref[0, h]                           # (T, Ne) bf16 (pre-scaled)
            kh = k_ref[0, h]                           # (T, Ne) bf16
            vh = v_ref[0, h]                           # (T, Ne) bf16
            # QK^T without materializing kh.T: contract over the last dims.
            s = lax.dot_general(qh, kh,
                                dimension_numbers=(((1,), (1,)), ((), ())),
                                preferred_element_type=jnp.float32)   # (T, T)
            if apply_mask:
                s = s + mask_bias
            m_prev = m_scr[h]                                          # (T, 1)
            m_new = jnp.maximum(m_prev, jnp.max(s, axis=-1, keepdims=True))
            alpha = jnp.exp(m_prev - m_new)
            pe = jnp.exp(s - m_new)                                    # (T, T) f32
            l_scr[h] = alpha * l_scr[h] + jnp.sum(pe, axis=-1, keepdims=True)
            acc_scr[h] = alpha * acc_scr[h] + jnp.dot(
                pe.astype(jnp.bfloat16), vh, preferred_element_type=jnp.float32)
            m_scr[h] = m_new
            return carry

        # Modest unroll: cross-head MXU/EUP/XLU overlap without blowing vregs.
        lax.fori_loop(0, n_head, head_body, 0, unroll=2 if n_head > 1 else 1)

    # Interior tiles (strictly below the diagonal): no mask work at all.
    @pl.when(ki < qi)
    def _():
        process_tile(False)

    # Diagonal tile: masked; it is also the last kv tile for this query tile,
    # so normalize and run the fused output projection afterwards.
    @pl.when(ki == qi)
    def _():
        process_tile(True)

        ne = acc_scr.shape[-1]
        for h in range(n_head):                      # static, fully unrolled
            inv_l = pl.reciprocal(l_scr[h], approx=False)              # (T, 1)
            y_scr[:, h * ne:(h + 1) * ne] = (acc_scr[h] * inv_l).astype(jnp.bfloat16)
        # Single full-depth (T, C) x (C, C) output projection on the MXU.
        y = jnp.dot(y_scr[...], wp_ref[...], preferred_element_type=jnp.float32)
        o_ref[0] = (y + bp_ref[...]).astype(o_ref.dtype)


# -----------------------------------------------------------------------------
# Wrapper
# -----------------------------------------------------------------------------
def causal_self_attention(x, w_attn, b_attn, w_proj, b_proj, *, n_head,
                          seq_tile=256, vmem_limit_bytes=48 * 1024 * 1024):
    """Forward of minGPT CausalSelfAttention (inference; dropout = identity).

    x: (B, S, C).  w_attn: (C, 3C), b_attn: (3C,) or (1, 3C) (torch Linear
    weights transposed, so the math is x @ W + b).  w_proj: (C, C),
    b_proj: (C,) or (1, C).  Output keeps x.dtype (module semantics).
    """
    B, S, C = x.shape
    assert C % n_head == 0
    Ne = C // n_head
    scale = 1.0 / math.sqrt(Ne)

    # v7x has only 64 MiB VMEM (vs 128 on v5e/v6e): shrink the default tile
    # for very wide models so the same tiling stays within budget.
    if C >= 1024 and seq_tile > 128:
        seq_tile = 128

    # One tile size for both query and kv tiles (multiple of 8).  Pad S up to a
    # tile multiple and slice back, instead of degrading the tile for ragged S.
    T = max(8, min(_round_up(seq_tile, 8), _round_up(S, 8)))
    S_pad = _round_up(S, T)
    n_q = S_pad // T

    # ---- trace-time parameter prep (one-off XLA ops) -------------------------
    w_attn = jnp.asarray(w_attn, jnp.float32)
    b_attn = jnp.asarray(b_attn, jnp.float32).reshape(1, 3 * C)
    scale_vec = jnp.concatenate([jnp.full((C,), scale, jnp.float32),
                                 jnp.ones((2 * C,), jnp.float32)])
    w_eff = (w_attn * scale_vec[None, :]).astype(jnp.bfloat16)  # 1/sqrt(Ne) in Q
    b_eff = (b_attn * scale_vec[None, :]).astype(jnp.float32)
    wp = jnp.asarray(w_proj).astype(jnp.bfloat16)
    bp = jnp.asarray(b_proj, jnp.float32).reshape(1, C)

    x_bf = x.astype(jnp.bfloat16)
    if S_pad != S:
        x_bf = jnp.pad(x_bf, ((0, 0), (0, S_pad - S), (0, 0)))

    # ---- stage 1: QKV projection (full-width MXU, once per token) ------------
    qkv = pl.pallas_call(
        _qkv_proj_kernel,
        out_shape=jax.ShapeDtypeStruct((B, S_pad, 3 * C), jnp.bfloat16),
        grid_spec=pltpu.PrefetchScalarGridSpec(
            num_scalar_prefetch=0,
            grid=(B, n_q),
            in_specs=[
                pl.BlockSpec((1, T, C), lambda b, i: (b, i, 0)),
                pl.BlockSpec((C, 3 * C), lambda b, i: (0, 0)),
                pl.BlockSpec((1, 3 * C), lambda b, i: (0, 0)),
            ],
            out_specs=pl.BlockSpec((1, T, 3 * C), lambda b, i: (b, i, 0)),
        ),
        compiler_params=pltpu.CompilerParams(
            dimension_semantics=("parallel", "parallel"),
            vmem_limit_bytes=vmem_limit_bytes,
        ),
    )(x_bf, w_eff, b_eff)

    # Per-head layout (B, n_head, S_pad, Ne): head slicing inside the attention
    # kernel becomes plain leading-dim indexing (no 64-wide lane slices).
    qkv = qkv.reshape(B, S_pad, 3, n_head, Ne).transpose(2, 0, 3, 1, 4)
    q, k, v = qkv[0], qkv[1], qkv[2]

    # ---- stage 2: flash attention over lower-triangular tile pairs -----------
    pair_q, pair_k = [], []
    for qi in range(n_q):
        for ki in range(qi + 1):
            pair_q.append(qi)
            pair_k.append(ki)
    qi_tbl = jnp.array(pair_q, dtype=jnp.int32)
    ki_tbl = jnp.array(pair_k, dtype=jnp.int32)
    n_pairs = len(pair_q)

    kernel = functools.partial(_flash_attn_kernel, n_head=n_head, tile_s=T)

    out = pl.pallas_call(
        kernel,
        out_shape=jax.ShapeDtypeStruct((B, S_pad, C), x.dtype),
        grid_spec=pltpu.PrefetchScalarGridSpec(
            num_scalar_prefetch=2,
            grid=(B, n_pairs),
            in_specs=[
                pl.BlockSpec((1, n_head, T, Ne), lambda b, p, qt, kt: (b, 0, qt[p], 0)),
                pl.BlockSpec((1, n_head, T, Ne), lambda b, p, qt, kt: (b, 0, kt[p], 0)),
                pl.BlockSpec((1, n_head, T, Ne), lambda b, p, qt, kt: (b, 0, kt[p], 0)),
                pl.BlockSpec((C, C), lambda b, p, qt, kt: (0, 0)),
                pl.BlockSpec((1, C), lambda b, p, qt, kt: (0, 0)),
            ],
            out_specs=pl.BlockSpec((1, T, C), lambda b, p, qt, kt: (b, qt[p], 0)),
            scratch_shapes=[
                pltpu.VMEM((n_head, T, 1), jnp.float32),    # running max m
                pltpu.VMEM((n_head, T, 1), jnp.float32),    # running denom l
                pltpu.VMEM((n_head, T, Ne), jnp.float32),   # running PV accumulator
                pltpu.VMEM((T, C), jnp.bfloat16),           # packed head slab
            ],
        ),
        compiler_params=pltpu.CompilerParams(
            # B (and the per-batch independence) feeds both v7x TensorCores.
            dimension_semantics=("parallel", "arbitrary"),
            vmem_limit_bytes=vmem_limit_bytes,
        ),
    )(qi_tbl, ki_tbl, q, k, v, wp, bp)

    if S_pad != S:
        out = out[:, :S, :]
    return out


# -----------------------------------------------------------------------------
# Pure-JAX f32 reference mirroring the PyTorch forward (dropout = identity).
# -----------------------------------------------------------------------------
def _reference(x, w_attn, b_attn, w_proj, b_proj, n_head):
    B, S, C = x.shape
    Ne = C // n_head
    qkv = x @ w_attn + jnp.reshape(b_attn, (1, 1, 3 * C))
    q, k, v = jnp.split(qkv, 3, axis=-1)

    def heads(t):
        return t.reshape(B, S, n_head, Ne).transpose(0, 2, 1, 3)

    q, k, v = heads(q), heads(k), heads(v)
    att = (q @ k.transpose(0, 1, 3, 2)) / math.sqrt(Ne)
    mask = jnp.tril(jnp.ones((S, S), bool))[None, None]
    att = jnp.where(mask, att, -jnp.inf)
    att = jax.nn.softmax(att, axis=-1)
    y = att @ v
    y = y.transpose(0, 2, 1, 3).reshape(B, S, C)
    return y @ w_proj + jnp.reshape(b_proj, (1, 1, C))


if __name__ == "__main__":
    key = jax.random.PRNGKey(0)
    keys = jax.random.split(key, 10)

    def make_inputs(ks, B, S, C):
        lim = 1.0 / math.sqrt(C)
        x = jax.random.normal(ks[0], (B, S, C), jnp.float32)
        w_attn = jax.random.uniform(ks[1], (C, 3 * C), jnp.float32, -lim, lim)
        b_attn = jax.random.uniform(ks[2], (1, 3 * C), jnp.float32, -lim, lim)
        w_proj = jax.random.uniform(ks[3], (C, C), jnp.float32, -lim, lim)
        b_proj = jax.random.uniform(ks[4], (1, C), jnp.float32, -lim, lim)
        return x, w_attn, b_attn, w_proj, b_proj

    # --- test 1: tiny config (single-tile path): B=2, S=8, C=32, n_head=4 ----
    args1 = make_inputs(keys[:5], 2, 8, 32)
    y1 = jax.block_until_ready(causal_self_attention(*args1, n_head=4))
    y1_ref = _reference(*args1, n_head=4)
    assert y1.shape == (2, 8, 32)
    assert jnp.allclose(y1, y1_ref, atol=2e-2, rtol=2e-2), "tiny-config mismatch"

    # --- test 2: multi-tile + ragged-S path (padding, interior unmasked tiles,
    #     diagonal masked tile, lower-triangular pair grid, finalize path) -----
    args2 = make_inputs(keys[5:], 2, 320, 128)
    y2 = jax.block_until_ready(causal_self_attention(*args2, n_head=4))
    y2_ref = _reference(*args2, n_head=4)
    assert y2.shape == (2, 320, 128)
    assert jnp.allclose(y2, y2_ref, atol=3e-2, rtol=3e-2), "multi-tile mismatch"

    print("KERNEL_OK")
</pallas_src>

<mosaic_0001>
module attributes {stable_mosaic.version = 11 : i64} {
  func.func @_qkv_proj_kernel(%arg0: i32, %arg1: i32, %arg2: memref<1x8x32xbf16, #tpu.memory_space<vmem>>, %arg3: memref<32x96xbf16, #tpu.memory_space<vmem>>, %arg4: memref<1x96xf32, #tpu.memory_space<vmem>>, %arg5: memref<1x8x96xbf16, #tpu.memory_space<vmem>>) attributes {dimension_semantics = [#tpu.dimension_semantics<parallel>, #tpu.dimension_semantics<parallel>], iteration_bounds = array<i64: 2, 1>, scalar_prefetch = 0 : i64, scratch_operands = 0 : i64, tpu.core_type = #tpu.core_type<tc>, window_params = [{transform_indices = @transform_0, window_bounds = array<i64: 1, 8, 32>}, {pipeline_mode = #tpu.pipeline_mode<synchronous>, transform_indices = @transform_1, window_bounds = array<i64: 32, 96>}, {pipeline_mode = #tpu.pipeline_mode<synchronous>, transform_indices = @transform_2, window_bounds = array<i64: 1, 96>}, {transform_indices = @transform_3, window_bounds = array<i64: 1, 8, 96>}]} {
    %c0 = arith.constant 0 : index
    %c0_0 = arith.constant 0 : index
    %c0_1 = arith.constant 0 : index
    %0 = vector.load %arg2[%c0, %c0_0, %c0_1] : memref<1x8x32xbf16, #tpu.memory_space<vmem>>, vector<1x8x32xbf16>
    %1 = vector.shape_cast %0 : vector<1x8x32xbf16> to vector<8x32xbf16>
    %c0_2 = arith.constant 0 : index
    %c0_3 = arith.constant 0 : index
    %2 = vector.load %arg3[%c0_2, %c0_3] : memref<32x96xbf16, #tpu.memory_space<vmem>>, vector<32x96xbf16>
    %cst = arith.constant dense<0.000000e+00> : vector<8x96xf32>
    %3 = tpu.matmul %1, %2, %cst {dimension_numbers = #tpu.dot_dimension_numbers<[1], [0], [0], [1], [0, 0, 1, 1], [], []>} : vector<8x32xbf16>, vector<32x96xbf16>, vector<8x96xf32> -> vector<8x96xf32>
    %c0_4 = arith.constant 0 : index
    %c0_5 = arith.constant 0 : index
    %4 = vector.load %arg4[%c0_4, %c0_5] : memref<1x96xf32, #tpu.memory_space<vmem>>, vector<1x96xf32>
    %5 = vector.broadcast %4 : vector<1x96xf32> to vector<8x96xf32>
    %6 = arith.addf %3, %5 : vector<8x96xf32>
    %7 = arith.truncf %6 : vector<8x96xf32> to vector<8x96xbf16>
    %c0_6 = arith.constant 0 : index
    %c0_7 = arith.constant 0 : index
    %c0_8 = arith.constant 0 : index
    %8 = vector.load %arg5[%c0_6, %c0_7, %c0_8] : memref<1x8x96xbf16, #tpu.memory_space<vmem>>, vector<1x8x96xbf16>
    %9 = vector.shape_cast %8 : vector<1x8x96xbf16> to vector<8x96xbf16>
    %10 = vector.shape_cast %7 : vector<8x96xbf16> to vector<1x8x96xbf16>
    tpu.vector_store %arg5[%c0_6, %c0_7, %c0_8], %10 {strides = array<i32>} : memref<1x8x96xbf16, #tpu.memory_space<vmem>>, vector<1x8x96xbf16>,
    return
  }
  func.func @transform_0(%arg0: i32, %arg1: i32) -> (i32, i32, i32) {
    %c0_i32 = arith.constant 0 : i32
    %c0_i32_0 = arith.constant 0 : i32
    return %arg0, %arg1, %c0_i32 : i32, i32, i32
  }
  func.func @transform_1(%arg0: i32, %arg1: i32) -> (i32, i32) {
    %c0_i32 = arith.constant 0 : i32
    %c0_i32_0 = arith.constant 0 : i32
    %c0_i32_1 = arith.constant 0 : i32
    return %c0_i32, %c0_i32_0 : i32, i32
  }
  func.func @transform_2(%arg0: i32, %arg1: i32) -> (i32, i32) {
    %c0_i32 = arith.constant 0 : i32
    %c0_i32_0 = arith.constant 0 : i32
    %c0_i32_1 = arith.constant 0 : i32
    return %c0_i32, %c0_i32_0 : i32, i32
  }
  func.func @transform_3(%arg0: i32, %arg1: i32) -> (i32, i32, i32) {
    %c0_i32 = arith.constant 0 : i32
    %c0_i32_0 = arith.constant 0 : i32
    return %arg0, %arg1, %c0_i32 : i32, i32, i32
  }
}

</mosaic_0001>

<bundles_post_ra>
// kernel: tpu_custom_call.1
= control target key start
LH: loop header
LB: loop body
LE: loop exit
PB: predicated region body
PF: predicated region fallthrough
CT: control target
= control target key end

     0   :  { %8 = vsyncpa [#allocation3], 0  ;;  %s894_s0 = inlined_call_operand.hbm [shape: bf16[2,8,32], index: 0, kind: input, shape index: {}]   ;;  %s895_s1 = inlined_call_operand.hbm [shape: bf16[32,96], index: 1, kind: input, shape index: {}]   ;;  %s896_s2 = inlined_call_operand.vmem [shape: f32[1,96], index: 2, kind: input, shape index: {}]   ;;  %s897_s3 = inlined_call_operand.hbm [shape: bf16[2,8,96], index: 3, kind: output, shape index: {}]  }
   0x1   :  { %10 = vsyncpa [#allocation3 + $0x1], 0 }
   0x2   :  { %11 = vsyncpa [#allocation6], 0 }
   0x3   :  { %12 = vsyncpa [#allocation4], 0 }
   0x4   :  { %14 = vsyncpa [#allocation4 + $0x1], 0  ;;  %s677_s12 = smov 0   ;;  %s679_s13 = smov 0  }
   0x5   :  { %s681_s14 = smov 0   ;;  %s683_s15 = smov 0  }
   0x6   :  { %s685_s16 = smov 0   ;;  %s687_s17 = smov 0  }
   0x7 LB: > { %s395_s18 = sadd.s32 4294967295, %s648_s17   ;;  %s396_s19 = sadd.s32 4294967294, %s648_s17   ;;  %s648_s17 = sphi %s687_s17, %s20_s17   ;;  %s644_s16 = sphi %s685_s16, %s921_s16   ;;  %s640_s15 = sphi %s683_s15, %s920_s15   ;;  %s636_s14 = sphi %s681_s14, %s919_s14   ;;  %s632_s13 = sphi %s679_s13, %s918_s13   ;;  %s628_s12 = sphi %s677_s12, %s917_s12  }
   0x8   : > { %p54_p0 = scmp.ne.s32.totalorder %s632_s13, %s628_s12  ;;  %p711_p1 = scmp.eq.s32.totalorder %s395_s18, 0 }
   0x9   : > { %p715_p2 = scmp.eq.s32.totalorder %s395_s18, 1  ;;  %p128_p3 = scmp.eq.s32.totalorder %s396_s19, 1 }
   0xa   : > { %s902_s20 = scalar_select %p711_p1, 1, 0 }
   0xb   : > { %s903_s21 = scalar_select %p715_p2, 1, 0 }
   0xc   : > { %p721_p4 = por %p711_p1, %p54_p0  ;;  %p397_p5 = scmp.ge.s32.totalorder %s648_s17, 1 }
   0xd   : > { %p726_p6 = por %p128_p3, %p54_p0  ;;  %p135_p7 = scmp.lt.s32.totalorder %s648_s17, 3 }
   0xe   : > { %s904_s22 = scalar_select %p721_p4, 1, 0 }
   0xf   : > { %s905_s23 = scalar_select %p726_p6, 1, 0 }
  0x10   : > { %p731_p8 = pnand %p397_p5, %p135_p7  ;;  %s650_s25 = smov [#allocation5]  }
  0x11   : > { %s147_s26 = sshll.u32 %s650_s25, 4  ;;  %s32_s28 = sadd.s32 1, %s644_s16  ;;  %s148_s26 = int_to_ptr.vmem [resolvable:$true] %s147_s26 }
  0x12   : > { %s906_s24 = scalar_select %p731_p8, 1, 0 }
  0x13   : > { %p433_p9 = pneg %p731_p8  ;;  %s504_s4 = scalar_lea.hbm %s895_s1, 256 }
  0x14   : > { %p505_p12 = scmp.ne.s32.totalorder %s895_s1, %s504_s4  ;;  %p511_p5 = scmp.lt.u32.totalorder %s504_s4, %s895_s1 }
  0x15   : > { %p740_p11 = pnand %p433_p9, %p711_p1 }
  0x17   : > { %p506_p13 = pneg %p740_p11 }
  0x19   : > { %p507_p0 = pnand %p506_p13, %p505_p12 }
  0x1b   : > { %p508_p3 = pneg %p507_p0 }
  0x1d   : > { %p513_p7 = pnand %p511_p5, %p508_p3 }
  0x1f   : > { %516 = shalt.err (!%p513_p7)
}
  0x20   : > { %s517_s9 = scalar_lea.vmem %s148_s26, 256  ;;  %p525_p1 = scmp.lt.s32.totalorder %s148_s26, %s148_s26 }
  0x21   : > { %p518_p9 = scmp.ne.s32.totalorder %s148_s26, %s517_s9  ;;  %p526_p4 = scmp.lt.s32.totalorder %s517_s9, %s517_s9 }
  0x23   : > { %p520_p10 = pnand %p518_p9, %p506_p13  ;;  %p527_p8 = por %p526_p4, %p525_p1 }
  0x25   : > { %p521_p6 = pneg %p520_p10 }
  0x27   : > { %p528_p2 = pnand %p527_p8, %p521_p6 }
  0x29   : > { %531 = shalt.err (!%p528_p2)
}
  0x2a   : > { %s651_s10 = smov 64   ;;  %s652_s11 = smov 4  }
  0x2b   : > { %436 = dma.hbm_to_vmem [thread:$0]  (!%p740_p11), %s895_s1, 256, %s148_s26, [#allocation6], %s651_s10, %s651_s10, %s652_s11  }
  0x2c   : > { %p34_p1 = scmp.ge.s32.totalorder %s32_s28, 2  ;;  %s41_s25 = sadd.s32 1, %s636_s14 }
  0x2d   : > { %p48_p2 = scmp.ne.s32.totalorder %s636_s14, %s632_s13  ;;  %p49_p4 = scmp.eq.s32.totalorder %s648_s17, 0 }
  0x2e   : > { %s923_s28 = smov (%p34_p1, %s32_s28), 0  ;;  %p909_p8 = scmp.ne.s32.totalorder %s903_s21, 0 }
  0x2f   : > { %p767_p6 = por %p49_p4, %p48_p2  ;;  %s36_s27 = ssub.s32 %s644_s16, %s923_s28 }
  0x30   : > { %p773_p10 = por %p909_p8, %p48_p2  ;;  %p446_p12 = scmp.lt.s32.totalorder %s648_s17, 2 }
  0x31   : > { %p39_p11 = scmp.eq.s32.totalorder %s36_s27, 0  ;;  %s164_s26 = sand.u32 1, %s636_s14  }
  0x32   : > { %s400_s4 = sshll.u32 %s164_s26, 2  ;;  %s401_s6 = sshll.u32 %s644_s16, 6 }
  0x33   : > { %s782_s5 = scalar_select %p39_p11, %s636_s14, %s41_s25  }
  0x34   : > { %s788_s9 = scalar_lea.hbm %s894_s0, %s401_s6  ;;  %s168_s21 = scalar_lea.vmem [#allocation2], %s400_s4 }
  0x35   : > { %s176_s10 = sshll.u32 %s168_s21, 4  ;;  %p794_p13 = pnand %p446_p12, %p767_p6  ;;  %s790_s10 = int_to_ptr.vmem [resolvable:$true] %s176_s10 }
  0x36   : > { %s165_s18 = scalar_lea.sflag [#allocation3], %s164_s26  ;;  %s532_s19 = scalar_lea.hbm %s788_s9, 64 }
  0x37   : > { %p533_p0 = scmp.ne.s32.totalorder %s788_s9, %s532_s19  ;;  %p534_p3 = pneg %p794_p13 }
  0x38   : > { %s537_s4 = scalar_lea.hbm %s894_s0, 128  ;;  %p538_p9 = scmp.lt.u32.totalorder %s788_s9, %s894_s0 }
  0x39   : > { %p535_p5 = pnand %p534_p3, %p533_p0  ;;  %p539_p1 = scmp.lt.u32.totalorder %s537_s4, %s532_s19 }
  0x3a   : > { %p541_p4 = scmp.lt.u32.totalorder %s532_s19, %s788_s9 }
  0x3b   : > { %p536_p7 = pneg %p535_p5  ;;  %p540_p2 = por %p539_p1, %p538_p9 }
  0x3d   : > { %p542_p6 = por %p541_p4, %p540_p2 }
  0x3f   : > { %p543_p8 = pnand %p542_p6, %p536_p7 }
  0x41   : > { %546 = shalt.err (!%p543_p8)
}
  0x42   : > { %s547_s26 = scalar_lea.vmem %s790_s10, 64  ;;  %s653_s7 = smov [#allocation2]  }
  0x43   : > { %p548_p12 = scmp.ne.s32.totalorder %s790_s10, %s547_s26  ;;  %s552_s8 = sshll.u32 %s653_s7, 4  ;;  %s553_s8 = int_to_ptr.vmem [resolvable:$false] %s552_s8 }
  0x44   : > { %s554_s21 = scalar_lea.vmem %s553_s8, 128  ;;  %p555_p5 = scmp.lt.s32.totalorder %s790_s10, %s553_s8 }
  0x45   : > { %p550_p11 = pnand %p548_p12, %p534_p3  ;;  %p556_p9 = scmp.lt.s32.totalorder %s554_s21, %s547_s26 }
  0x47   : > { %p551_p0 = pneg %p550_p11  ;;  %p557_p1 = por %p556_p9, %p555_p5 }
  0x49   : > { %p558_p2 = pnand %p557_p1, %p551_p0 }
  0x4b   : > { %561 = shalt.err (!%p558_p2)
}
  0x4c   : > { %440 = dma.hbm_to_vmem [thread:$0]  (!%p794_p13), %s788_s9, 64, %s790_s10, %s165_s18  }
  0x4d   : > { %p912_p7 = scmp.ne.s32.totalorder %s906_s24, 0 }
  0x4e   : > { %s826_s19 = sand.u32 (!%p912_p7), 1, %s632_s13   ;;  %p913_p3 = scmp.ne.s32.totalorder (!%p912_p7), %s904_s22, 0 }
  0x4f   : > { %185 = sbr.rel (%p912_p7) target bundleno = 329 (0x149), region = 32  ;;  %s403_s25 = sshll.u32 (!%p912_p7), %s826_s19, 2 }
  0x50   : > { %s188_s27 = scalar_lea.sflag (!%p912_p7), [#allocation3], %s826_s19  ;;  %s191_s4 = scalar_lea.vmem (!%p912_p7), [#allocation2], %s403_s25 }
  0x56   : > { %615 = dma.done.wait (%p913_p3), %s188_s27, 64  }
  0x57   : > { %617 = vsyncadd (%p913_p3), %s188_s27, 4294967232  ;;  %p914_p4 = scmp.ne.s32.totalorder %s902_s20, 0 }
  0x59   : > { %619 = dma.done.wait (%p914_p4), [#allocation6], 256  }
  0x5a   : > { %621 = vsyncadd (%p914_p4), [#allocation6], 4294967040  ;;  %v654_v0 = vmov 0.0   ;;  %vm655_vm0 = vmmov 0   ;;  %v502_v1 = vld [vmem:[#allocation5] sm:$0xff]   ;;  %v503_v2 = vld [vmem:[#allocation5 + $0x8] sm:$0xff]  }
  0x5b   : > { %417 = vmatprep.subr.bf16.mxu0 %v654_v0  ;;  %421 = vmatprep.mubr.msk.bf16.mxu0 %vm655_vm0, %v654_v0  ;;  %v219_v3 = vld [vmem:[%s191_s4] sm:$0xf]  ;;  %vm243_vm1 = vcmask 261120   ;;  %s411_s20 = sshll.u32 %s640_s15, 6  ;;  %s217_s9 = scalar_lea.vmem [#allocation7], %s403_s25  ;;  %vm288_vm2 = vcmask 781312  }
  0x5c   : > { %418 = vmatpush3.bf16.msra.mxu0 %v502_v1  ;;  %v406_v4 = vld [vmem:[%s896_s2] ss:$0 sm:$0xff]  ;;  %s305_s10 = sshll.u32 %s217_s9, 4  ;;  %s845_s29 = scalar_lea.hbm %s897_s3, %s411_s20  ;;  %s847_s10 = int_to_ptr.vmem [resolvable:$true] %s305_s10 }
  0x5d   : > { %419 = vmatprep.subr.bf16.mxu0 %v654_v0  ;;  %s291_s15 = scalar_lea.sflag [#allocation4], %s826_s19  ;;  %s562_s6 = scalar_lea.vmem %s847_s10, 64 }
  0x5e   : > { %p563_p13 = scmp.ne.s32.totalorder %s847_s10, %s562_s6  ;;  %s656_s26 = smov [#allocation7]  }
  0x5f   : > { %s566_s7 = sshll.u32 %s656_s26, 4  ;;  %s567_s7 = int_to_ptr.vmem [resolvable:$false] %s566_s7 }
  0x60   : > { %420 = vmatpush3.bf16.msra.mxu0 %v503_v2  ;;  %p564_p6 = pnand %p563_p13, %p773_p10  ;;  %s568_s8 = scalar_lea.vmem %s567_s7, 128 }
  0x61   : > { %p569_p12 = scmp.lt.s32.totalorder %s847_s10, %s567_s7  ;;  %p570_p11 = scmp.lt.s32.totalorder %s568_s8, %s562_s6 }
  0x62   : > { %p565_p8 = pneg %p564_p6 }
  0x63   : > { %422 = vmatmul.mubr.msk.bf16.vlgmr.msra.gmra.mrb[0].mxu0 %vm243_vm1, %v219_v3  ;;  %p571_p0 = por %p570_p11, %p569_p12 }
  0x65   : > { %p572_p5 = pnand %p571_p0, %p565_p8 }
 0x136   : > { %v281_v5 = vpop.f32.mrb[0].mxu0 }
 0x137   : > { %v282_v6 = vadd.f32 %v406_v4, %v281_v5  ;;  %v423_v7 = vpop.f32.mrb[1].mxu0 }
 0x138   : > { %v284_v8 = vpop.f32.mrb[2].mxu0 }
 0x139   : > { %v287_v9 = vpack.c.bf16 %v282_v6, %v282_v6  ;;  %v424_v10 = vpop.f32.mrb[3].mxu0 }
 0x13b   : > { %289 = vst.msk [vmem:[%s217_s9] sm:$0xf] %vm288_vm2, %v287_v9 }
 0x13c   : > { %575 = shalt.err (!%p572_p5)
}
 0x13d   : > { %s576_s21 = scalar_lea.hbm %s845_s29, 64  ;;  %s580_s27 = scalar_lea.hbm %s897_s3, 128 }
 0x13e   : > { %p577_p9 = scmp.ne.s32.totalorder %s845_s29, %s576_s21  ;;  %p581_p7 = scmp.lt.u32.totalorder %s845_s29, %s897_s3 }
 0x13f   : > { %p582_p3 = scmp.lt.u32.totalorder %s580_s27, %s576_s21  ;;  %p584_p13 = scmp.lt.u32.totalorder %s576_s21, %s845_s29 }
 0x140   : > { %p578_p1 = pnand %p577_p9, %p773_p10 }
 0x141   : > { %p583_p4 = por %p582_p3, %p581_p7 }
 0x142   : > { %p579_p2 = pneg %p578_p1 }
 0x143   : > { %p585_p6 = por %p584_p13, %p583_p4 }
 0x145   : > { %p586_p8 = pnand %p585_p6, %p579_p2 }
 0x147   : > { %589 = shalt.err (!%p586_p8)
}
 0x148   : > { %431 = dma.vmem_to_hbm [thread:$0]  (%p773_p10), %s847_s10, 64, %s845_s29, %s291_s15  }
 0x149 PF: > { %s317_s24 = sand.u32 1, %s628_s12   ;;  %p915_p12 = scmp.ne.s32.totalorder %s905_s23, 0 }
 0x14a   : > { %p916_p11 = scmp.ge.s32.totalorder %s648_s17, 2  ;;  %s318_s20 = scalar_lea.sflag [#allocation4], %s317_s24 }
 0x14c   : > { %p442_p0 = pnand %p916_p11, %p915_p12 }
 0x14e   : > { %623 = dma.done.wait (!%p442_p0), %s318_s20, 64  }
 0x14f   : > { %625 = vsyncadd (!%p442_p0), %s318_s20, 4294967232  ;;  %s20_s17 = sadd.s32 1, %s648_s17   ;;  %s917_s12 = smov %s632_s13 }
 0x150   : > { %p17_p5 = scmp.ge.s32.totalorder %s20_s17, 4   ;;  %s918_s13 = smov %s636_s14 }
 0x151   : > { %s919_s14 = smov %s782_s5  ;;  %s920_s15 = smov %s644_s16 }
 0x152   : > { %s921_s16 = smov %s923_s28  ;;  %19 = sbr.rel (!%p17_p5) target bundleno = 7 (0x7), region = 81 }
 0x159   :  { %323 = vsyncpa [#allocation3], 1 }
 0x15a   :  { %325 = vsyncpa [#allocation3 + $0x1], 1 }
 0x15b   :  { %326 = vsyncpa [#allocation6], 1 }
 0x15c   :  { %327 = vsyncpa [#allocation4], 1 }
 0x15d   :  { %329 = vsyncpa [#allocation4 + $0x1], 1 }

</bundles_post_ra>
